<compile_context>
chip_gen: v7x
topology: tpu7x:2x2x1
jax: 0.10.0
libtpu: 0.0.40
codegen_flags: <defaults>
</compile_context>

<pallas_src>
import functools

import jax
import jax.numpy as jnp
from jax.experimental import pallas as pl
from jax.experimental.pallas import tpu as pltpu

F32 = jnp.float32
BF16 = jnp.bfloat16


def _round_up(x, m):
    return (x + m - 1) // m * m


# ---------------------------------------------------------------------------
# Fused matmul + bias + (optional) ReLU kernels:  out = act(A @ B + bias)
# ---------------------------------------------------------------------------
def _mm_kernel_single(a_ref, b_ref, bias_ref, o_ref, *, relu):
    # Single K step: no accumulator scratch, write straight to the output.
    r = jnp.dot(a_ref[...], b_ref[...], preferred_element_type=jnp.float32)
    r = r + bias_ref[...].astype(jnp.float32)
    if relu:
        r = jnp.maximum(r, 0.0)
    o_ref[...] = r.astype(o_ref.dtype)


def _mm_kernel_acc(a_ref, b_ref, bias_ref, o_ref, acc_ref, *, relu):
    @pl.when(pl.program_id(2) == 0)
    def _():
        acc_ref[...] = jnp.zeros_like(acc_ref)

    acc_ref[...] += jnp.dot(a_ref[...], b_ref[...],
                            preferred_element_type=jnp.float32)

    @pl.when(pl.program_id(2) == pl.num_programs(2) - 1)
    def _():
        r = acc_ref[...] + bias_ref[...].astype(jnp.float32)
        if relu:
            r = jnp.maximum(r, 0.0)
        o_ref[...] = r.astype(o_ref.dtype)


def matmul_bias_act(a, b, bias, *, relu, bias_along="n", out_dtype=None):
    """act(a @ b + bias).  a:(M,K), b:(K,N); bias:(M,) if bias_along=='m' else (N,)."""
    M, K = a.shape
    K2, N = b.shape
    assert K == K2
    out_dtype = out_dtype or jnp.result_type(a.dtype, b.dtype)

    # --- tile selection -----------------------------------------------------
    if M <= 512:
        tm, m_pad = M, M
    else:
        tm = 256
        m_pad = _round_up(M, tm)

    if K <= 6144:
        tk = K                       # single K step for every conv, fc2, fc3
    elif K % 4608 == 0:
        tk = 4608                    # fc1: 50688 = 11 * 4608
    else:
        tk = 2048
    k_pad = _round_up(K, tk)
    k_steps = k_pad // tk

    if N <= 512:
        tn = N                       # full-dim block (handles N = 2, 10, 437, ...)
    else:
        cap_out = max(512, (262144 // tm) // 128 * 128)    # out tile <= ~1 MiB f32
        cap_b = max(512, (2359296 // tk) // 128 * 128)     # B tile  <= ~4.5 MiB bf16
        tn = min(2048, cap_out, cap_b)

    # --- padding (M / K only; ragged N handled by Pallas boundary masking) ---
    if (m_pad, k_pad) != (M, K):
        a = jnp.pad(a, ((0, m_pad - M), (0, k_pad - K)))
    if k_pad != K:
        b = jnp.pad(b, ((0, k_pad - K), (0, 0)))

    if bias_along == "m":
        bias2 = bias.reshape(M, 1).astype(jnp.float32)
        if m_pad != M:
            bias2 = jnp.pad(bias2, ((0, m_pad - M), (0, 0)))
        bias_spec = pl.BlockSpec((tm, 1), lambda i, j, k: (i, 0))
    else:
        bias2 = bias.reshape(1, N).astype(jnp.float32)
        bias_spec = pl.BlockSpec((1, tn), lambda i, j, k: (0, j))

    grid = (m_pad // tm, pl.cdiv(N, tn), k_steps)

    if k_steps == 1:
        kernel = functools.partial(_mm_kernel_single, relu=relu)
        scratch = []
    else:
        kernel = functools.partial(_mm_kernel_acc, relu=relu)
        scratch = [pltpu.VMEM((tm, tn), jnp.float32)]

    out = pl.pallas_call(
        kernel,
        out_shape=jax.ShapeDtypeStruct((m_pad, N), out_dtype),
        grid=grid,
        in_specs=[
            pl.BlockSpec((tm, tk), lambda i, j, k: (i, k)),
            pl.BlockSpec((tk, tn), lambda i, j, k: (k, j)),
            bias_spec,
        ],
        out_specs=pl.BlockSpec((tm, tn), lambda i, j, k: (i, j)),
        scratch_shapes=scratch,
        compiler_params=pltpu.CompilerParams(
            dimension_semantics=("parallel", "parallel", "arbitrary"),
            vmem_limit_bytes=40 * 1024 * 1024),
    )(a, b, bias2)
    return out[:M] if m_pad != M else out


# ---------------------------------------------------------------------------
# MaxPool2d(kernel=2, stride=2, ceil_mode=True) as a 4-way elementwise max
# ---------------------------------------------------------------------------
def _maxpool_kernel(a_ref, b_ref, c_ref, d_ref, o_ref):
    o_ref[...] = jnp.maximum(jnp.maximum(a_ref[...], b_ref[...]),
                             jnp.maximum(c_ref[...], d_ref[...]))


def maxpool_2x2_ceil(x):
    """x: (C, H, W) -> (C, ceil(H/2), ceil(W/2)) matching PyTorch ceil_mode=True."""
    C, H, W = x.shape
    ph, pw = H % 2, W % 2
    if ph or pw:
        x = jnp.pad(x, ((0, 0), (0, ph), (0, pw)), constant_values=-jnp.inf)
    ho, wo = (H + ph) // 2, (W + pw) // 2
    a = x[:, 0::2, 0::2]
    b = x[:, 0::2, 1::2]
    c = x[:, 1::2, 0::2]
    d = x[:, 1::2, 1::2]

    # Pick the biggest channel block that keeps ~(4 in + 1 out) double-buffered
    # tiles under ~16 MiB of VMEM (fewer grid steps, better DMA utilization).
    per_chan = ho * wo * x.dtype.itemsize
    budget = 16 * 1024 * 1024
    cblk = C
    while cblk % 2 == 0 and cblk * per_chan * 10 > budget:
        cblk //= 2

    spec = pl.BlockSpec((cblk, ho, wo), lambda i: (i, 0, 0))
    return pl.pallas_call(
        _maxpool_kernel,
        out_shape=jax.ShapeDtypeStruct((C, ho, wo), x.dtype),
        grid=(C // cblk,),
        in_specs=[spec] * 4,
        out_specs=spec,
        compiler_params=pltpu.CompilerParams(
            dimension_semantics=("parallel",),
            vmem_limit_bytes=40 * 1024 * 1024),
    )(a, b, c, d)


# ---------------------------------------------------------------------------
# 3x3 VALID conv + bias + ReLU via im2col + flipped-orientation Pallas GEMM
# ---------------------------------------------------------------------------
def conv3x3_relu(x, w, b):
    """x: (Cin, H, W), w: (Cout, Cin, 3, 3), b: (Cout,) -> (Cout, H-2, W-2)."""
    cin, H, W = x.shape
    cout = w.shape[0]
    ho, wo = H - 2, W - 2
    # im2col without any transpose: rows are (cin, tap), columns are flattened
    # output pixels, so the GEMM result is already in (Cout, Ho*Wo) CHW order.
    # (Further work: an implicit-GEMM kernel accumulating the 9 shifted
    #  windows in-VMEM would remove the 9x im2col HBM duplication.)
    patches = jnp.stack(
        [x[:, kh:kh + ho, kw:kw + wo] for kh in range(3) for kw in range(3)],
        axis=1)                                      # (Cin, 9, Ho, Wo)
    patches = patches.reshape(cin * 9, ho * wo)      # (Cin*9, Ho*Wo), free reshape
    wm = w.reshape(cout, cin * 9)                    # (Cout, Cin*9), free reshape
    out = matmul_bias_act(wm, patches, b, relu=True, bias_along="m",
                          out_dtype=x.dtype)         # (Cout, Ho*Wo)
    return out.reshape(cout, ho, wo)


# ---------------------------------------------------------------------------
# Parameters (deterministic synthetic init, PyTorch-default-like scaling)
# ---------------------------------------------------------------------------
CONV_CFG = [("conv1", 1, 64), ("conv2", 64, 128), ("conv3", 128, 256),
            ("conv4", 256, 256), ("conv5", 256, 512), ("conv6", 512, 512),
            ("conv7", 512, 512), ("conv8", 512, 512)]
FC_CFG = [("fc1", 512 * 11 * 9, 4096), ("fc2", 4096, 4096), ("fc3", 4096, 10)]


def _uniform(key, shape, fan_in, dtype):
    bound = 1.0 / float(fan_in) ** 0.5
    return jax.random.uniform(key, shape, F32, minval=-bound,
                              maxval=bound).astype(dtype)


def init_params(key):
    params = {}
    for branch in ("1", "2"):
        for name, cin, cout in CONV_CFG:
            key, kw, kb_ = jax.random.split(key, 3)
            fan_in = cin * 9
            params[f"{name}_{branch}_w"] = _uniform(kw, (cout, cin, 3, 3), fan_in, BF16)
            params[f"{name}_{branch}_b"] = _uniform(kb_, (cout,), fan_in, F32)
        for name, fin, fout in FC_CFG:
            key, kw, kb_ = jax.random.split(key, 3)
            # Linear weight stored pre-transposed: (in_features, out_features)
            params[f"{name}_{branch}_w"] = _uniform(kw, (fin, fout), fin, BF16)
            params[f"{name}_{branch}_b"] = _uniform(kb_, (fout,), fin, F32)
    key, kw, kb_ = jax.random.split(key, 3)
    params["fc2_final_w"] = _uniform(kw, (20, 2), 20, BF16)
    params["fc2_final_b"] = _uniform(kb_, (2,), 20, F32)
    return params


# ---------------------------------------------------------------------------
# Forward pass (mirrors Net.forward exactly)
# ---------------------------------------------------------------------------
def branch_forward(x, p, sfx):
    # x: (1, H, W) single-channel image (one sample)
    x = x.astype(BF16)
    x = maxpool_2x2_ceil(conv3x3_relu(x, p[f"conv1_{sfx}_w"], p[f"conv1_{sfx}_b"]))
    x = maxpool_2x2_ceil(conv3x3_relu(x, p[f"conv2_{sfx}_w"], p[f"conv2_{sfx}_b"]))
    x = conv3x3_relu(x, p[f"conv3_{sfx}_w"], p[f"conv3_{sfx}_b"])
    x = maxpool_2x2_ceil(conv3x3_relu(x, p[f"conv4_{sfx}_w"], p[f"conv4_{sfx}_b"]))
    x = conv3x3_relu(x, p[f"conv5_{sfx}_w"], p[f"conv5_{sfx}_b"])
    x = maxpool_2x2_ceil(conv3x3_relu(x, p[f"conv6_{sfx}_w"], p[f"conv6_{sfx}_b"]))
    x = conv3x3_relu(x, p[f"conv7_{sfx}_w"], p[f"conv7_{sfx}_b"])
    x = maxpool_2x2_ceil(conv3x3_relu(x, p[f"conv8_{sfx}_w"], p[f"conv8_{sfx}_b"]))
    x = x.reshape(1, -1)  # (1, 512*11*9) — same (C,H,W) flatten order as torch.flatten
    x = matmul_bias_act(x, p[f"fc1_{sfx}_w"], p[f"fc1_{sfx}_b"], relu=True,
                        bias_along="n", out_dtype=BF16)
    x = matmul_bias_act(x, p[f"fc2_{sfx}_w"], p[f"fc2_{sfx}_b"], relu=True,
                        bias_along="n", out_dtype=BF16)
    x = matmul_bias_act(x, p[f"fc3_{sfx}_w"], p[f"fc3_{sfx}_b"], relu=False,
                        bias_along="n", out_dtype=BF16)
    return x  # (1, 10) bf16


def net_forward(params, x1, x2):
    # x1, x2: (1, 1, H, W) NCHW, batch size 1
    y1 = branch_forward(x1[0], params, "1")
    y2 = branch_forward(x2[0], params, "2")
    y = jnp.concatenate([y1, y2], axis=1)  # (1, 20)
    return matmul_bias_act(y, params["fc2_final_w"], params["fc2_final_b"],
                           relu=False, bias_along="n", out_dtype=F32)  # (1, 2)


if __name__ == "__main__":
    key = jax.random.PRNGKey(0)
    ka, kb, kc, kd, ke, kf, kg, kh_, kp, k1, k2 = jax.random.split(key, 11)

    # 1) fused matmul + bias + ReLU, single-K path, bias along N
    a = jax.random.normal(ka, (37, 100), F32).astype(BF16)
    bm = jax.random.normal(kb, (100, 64), F32).astype(BF16)
    bias = jax.random.normal(kc, (64,), F32)
    got = matmul_bias_act(a, bm, bias, relu=True, bias_along="n", out_dtype=F32)
    want = jnp.maximum(a.astype(F32) @ bm.astype(F32) + bias, 0.0)
    assert jnp.allclose(got, want, atol=5e-2, rtol=5e-2), "matmul(single-K) mismatch"

    # 2) multi-K accumulator path, bias along M
    a2 = jax.random.normal(kd, (8, 9216), F32).astype(BF16)
    b2 = jax.random.normal(ke, (9216, 256), F32).astype(BF16)
    bias2 = jax.random.normal(kf, (8,), F32)
    got2 = matmul_bias_act(a2, b2, bias2, relu=False, bias_along="m", out_dtype=F32)
    want2 = a2.astype(F32) @ b2.astype(F32) + bias2[:, None]
    assert jnp.allclose(got2, want2, atol=2e-1, rtol=2e-2), "matmul(multi-K) mismatch"

    # 3) 3x3 conv (flipped-orientation GEMM) vs lax.conv reference
    xc = jax.random.normal(kg, (3, 10, 12), F32).astype(BF16)
    wc = (jax.random.normal(kh_, (5, 3, 3, 3), F32) * 0.2).astype(BF16)
    bc = jnp.linspace(-0.5, 0.5, 5).astype(F32)
    got_c = conv3x3_relu(xc, wc, bc).astype(F32)
    ref_c = jax.lax.conv_general_dilated(
        xc.astype(F32)[None], wc.astype(F32), (1, 1), "VALID",
        dimension_numbers=("NCHW", "OIHW", "NCHW"))[0]
    ref_c = jnp.maximum(ref_c + bc[:, None, None], 0.0)
    assert jnp.allclose(got_c, ref_c, atol=1e-1, rtol=1e-1), "conv mismatch"

    # 4) ceil-mode 2x2 maxpool
    xp = jax.random.normal(kp, (8, 7, 9), F32).astype(BF16)
    got_p = maxpool_2x2_ceil(xp)
    xpad = jnp.pad(xp, ((0, 0), (0, 1), (0, 1)), constant_values=-jnp.inf)
    want_p = jnp.max(xpad.reshape(8, 4, 2, 5, 2), axis=(2, 4))
    assert bool(jnp.array_equal(got_p, want_p)), "maxpool mismatch"

    # 5) full network.  Input spatial size 440x376 is dictated by
    #    fc1 in_features = 512*11*9 (the smallest size the module accepts).
    params = init_params(jax.random.PRNGKey(42))
    x1 = jax.random.normal(k1, (1, 1, 440, 376), F32)
    x2 = jax.random.normal(k2, (1, 1, 440, 376), F32)

    fwd = jax.jit(net_forward)
    out = fwd(params, x1, x2)
    jax.block_until_ready(out)
    assert out.shape == (1, 2) and out.dtype == F32
    assert bool(jnp.all(jnp.isfinite(out)))
    print("KERNEL_OK")
</pallas_src>

<mosaic_0001>
module attributes {stable_mosaic.version = 11 : i64} {
  func.func @_mm_kernel_single(%arg0: i32, %arg1: i32, %arg2: i32, %arg3: memref<37x100xbf16, #tpu.memory_space<vmem>>, %arg4: memref<100x64xbf16, #tpu.memory_space<vmem>>, %arg5: memref<1x64xf32, #tpu.memory_space<vmem>>, %arg6: memref<37x64xf32, #tpu.memory_space<vmem>>) attributes {dimension_semantics = [#tpu.dimension_semantics<parallel>, #tpu.dimension_semantics<parallel>, #tpu.dimension_semantics<arbitrary>], iteration_bounds = array<i64: 1, 1, 1>, scalar_prefetch = 0 : i64, scratch_operands = 0 : i64, tpu.core_type = #tpu.core_type<tc>, window_params = [{transform_indices = @transform_0, window_bounds = array<i64: 37, 100>}, {transform_indices = @transform_1, window_bounds = array<i64: 100, 64>}, {transform_indices = @transform_2, window_bounds = array<i64: 1, 64>}, {transform_indices = @transform_3, window_bounds = array<i64: 37, 64>}]} {
    %c0 = arith.constant 0 : index
    %c0_0 = arith.constant 0 : index
    %0 = vector.load %arg3[%c0, %c0_0] : memref<37x100xbf16, #tpu.memory_space<vmem>>, vector<37x100xbf16>
    %c0_1 = arith.constant 0 : index
    %c0_2 = arith.constant 0 : index
    %1 = vector.load %arg4[%c0_1, %c0_2] : memref<100x64xbf16, #tpu.memory_space<vmem>>, vector<100x64xbf16>
    %cst = arith.constant dense<0.000000e+00> : vector<37x64xf32>
    %2 = tpu.matmul %0, %1, %cst {dimension_numbers = #tpu.dot_dimension_numbers<[1], [0], [0], [1], [0, 0, 1, 1], [], []>} : vector<37x100xbf16>, vector<100x64xbf16>, vector<37x64xf32> -> vector<37x64xf32>
    %c0_3 = arith.constant 0 : index
    %c0_4 = arith.constant 0 : index
    %3 = vector.load %arg5[%c0_3, %c0_4] : memref<1x64xf32, #tpu.memory_space<vmem>>, vector<1x64xf32>
    %4 = vector.broadcast %3 : vector<1x64xf32> to vector<37x64xf32>
    %5 = arith.addf %2, %4 : vector<37x64xf32>
    %cst_5 = arith.constant 0.000000e+00 : f32
    %6 = vector.broadcast %cst_5 : f32 to vector<37x64xf32>
    %7 = arith.maximumf %5, %6 : vector<37x64xf32>
    %c0_6 = arith.constant 0 : index
    %c0_7 = arith.constant 0 : index
    %8 = vector.load %arg6[%c0_6, %c0_7] : memref<37x64xf32, #tpu.memory_space<vmem>>, vector<37x64xf32>
    tpu.vector_store %arg6[%c0_6, %c0_7], %7 {strides = array<i32>} : memref<37x64xf32, #tpu.memory_space<vmem>>, vector<37x64xf32>,
    return
  }
  func.func @transform_0(%arg0: i32, %arg1: i32, %arg2: i32) -> (i32, i32) {
    %c0_i32 = arith.constant 0 : i32
    return %arg0, %arg2 : i32, i32
  }
  func.func @transform_1(%arg0: i32, %arg1: i32, %arg2: i32) -> (i32, i32) {
    %c0_i32 = arith.constant 0 : i32
    return %arg2, %arg1 : i32, i32
  }
  func.func @transform_2(%arg0: i32, %arg1: i32, %arg2: i32) -> (i32, i32) {
    %c0_i32 = arith.constant 0 : i32
    %c0_i32_0 = arith.constant 0 : i32
    return %c0_i32, %arg1 : i32, i32
  }
  func.func @transform_3(%arg0: i32, %arg1: i32, %arg2: i32) -> (i32, i32) {
    %c0_i32 = arith.constant 0 : i32
    return %arg0, %arg1 : i32, i32
  }
}

</mosaic_0001>

<bundles_post_ra>
// kernel: tpu_custom_call.1
= control target key start
LH: loop header
LB: loop body
LE: loop exit
PB: predicated region body
PF: predicated region fallthrough
CT: control target
= control target key end

     0   :  { %v294_v1 = vmov 0.0   ;;  %vm295_vm0 = vmmov 0   ;;  %s367_s0 = inlined_call_operand.vmem [shape: bf16[37,100], index: 0, kind: input, shape index: {}]   ;;  %s368_s1 = inlined_call_operand.vmem [shape: bf16[100,64], index: 1, kind: input, shape index: {}]   ;;  %s369_s2 = inlined_call_operand.vmem [shape: f32[1,64], index: 2, kind: input, shape index: {}]   ;;  %s370_s3 = inlined_call_operand.hbm [shape: f32[37,64], index: 3, kind: output, shape index: {}]  }
   0x1   :  { %v260_v0 = vld [vmem:[%s368_s1] sm:$0xff]   ;;  %241 = vmatprep.subr.bf16.mxu1 %v294_v1  ;;  %215 = vmatprep.subr.bf16.mxu0 %v294_v1  ;;  %v261_v2 = vld [vmem:[%s368_s1 + $0x8] sm:$0xff]   ;;  %v262_v3 = vld [vmem:[%s368_s1 + $0x10] sm:$0xff]  }
   0x2   :  { %248 = vmatpush3.bf16.msra.mxu1 %v260_v0  ;;  %216 = vmatpush3.bf16.msra.mxu0 %v260_v0  ;;  %v263_v4 = vld [vmem:[%s368_s1 + $0x18] sm:$0xff]  }
   0x3   :  { %242 = vmatprep.subr.bf16.mxu1 %v294_v1  ;;  %217 = vmatprep.subr.bf16.mxu0 %v294_v1 }
   0x4   :  { %233 = vmatprep.mubr.msk.bf16.mxu1 %vm295_vm0, %v294_v1  ;;  %229 = vmatprep.mubr.msk.bf16.mxu0 %vm295_vm0, %v294_v1 }
   0x6   :  { %249 = vmatpush3.bf16.msra.mxu1 %v261_v2  ;;  %218 = vmatpush3.bf16.msra.mxu0 %v261_v2 }
   0x7   :  { %243 = vmatprep.subr.bf16.mxu1 %v294_v1  ;;  %219 = vmatprep.subr.bf16.mxu0 %v294_v1 }
   0xa   :  { %250 = vmatpush3.bf16.msra.mxu1 %v262_v3  ;;  %220 = vmatpush3.bf16.msra.mxu0 %v262_v3 }
   0xb   :  { %8 = vsyncpa [#allocation3], 0  ;;  %244 = vmatprep.subr.bf16.mxu1 %v294_v1  ;;  %221 = vmatprep.subr.bf16.mxu0 %v294_v1  ;;  %v264_v5 = vld [vmem:[%s368_s1 + $0x20] sm:$0xff]   ;;  %v265_v6 = vld [vmem:[%s368_s1 + $0x28] sm:$0xff]   ;;  %vm103_vm1 = vcmask 1041408   ;;  %vm93_vm2 = vcmask 818176  }
   0xc   :  { %v266_v7 = vld [vmem:[%s368_s1 + $0x30] ss:$0 sps:$4 sm:$0x33]   ;;  %v267_v9 = vld [vmem:[%s367_s0 + $0x8] sm:$0xff]   ;;  %v268_v10 = vld [vmem:[%s367_s0] sm:$0xff]   ;;  %vm168_vm3 = vcmask 523264  }
   0xd   :  { %v105_v8 = vsel %vm103_vm1, %v266_v7, 0  ;;  %v269_v11 = vld [vmem:[%s367_s0 + $0x10] ss:$0 sps:$4 sm:$0x77]   ;;  %v191_v12 = vld [vmem:[%s369_s2] ss:$0 sm:$0xff] }
   0xe   :  { %251 = vmatpush3.bf16.msra.mxu1 %v263_v4  ;;  %222 = vmatpush3.bf16.msra.mxu0 %v263_v4  ;;  %s296_s0 = smov [#allocation2]   ;;  %vm173_vm4 = vcmask 520192  }
   0xf   :  { %245 = vmatprep.subr.bf16.mxu1 %v294_v1  ;;  %223 = vmatprep.subr.bf16.mxu0 %v294_v1  ;;  %s180_s2 = sshll.u32 %s296_s0, 4  ;;  %s181_s2 = int_to_ptr.vmem [resolvable:$true] %s180_s2 }
  0x10   :  { %s270_s6 = scalar_lea.vmem %s181_s2, 640  ;;  %p275_p1 = scmp.lt.s32.totalorder %s181_s2, %s181_s2 }
  0x11   :  { %p271_p0 = scmp.ne.s32.totalorder %s181_s2, %s270_s6  ;;  %p276_p2 = scmp.lt.s32.totalorder %s270_s6, %s270_s6 }
  0x12   :  { %252 = vmatpush3.bf16.msra.mxu1 %v264_v5  ;;  %224 = vmatpush3.bf16.msra.mxu0 %v264_v5 }
  0x13   :  { %246 = vmatprep.subr.bf16.mxu1 %v294_v1  ;;  %225 = vmatprep.subr.bf16.mxu0 %v294_v1  ;;  %p277_p3 = por %p276_p2, %p275_p1 }
  0x15   :  { %p278_p4 = pnand %p277_p3, %p271_p0 }
  0x16   :  { %253 = vmatpush3.bf16.msra.mxu1 %v265_v6  ;;  %226 = vmatpush3.bf16.msra.mxu0 %v265_v6 }
  0x17   :  { %247 = vmatprep.subr.bf16.mxu1 %v294_v1  ;;  %227 = vmatprep.subr.bf16.mxu0 %v294_v1 }
  0x1a   :  { %254 = vmatpush3.bf16.msra.mxu1 %v105_v8  ;;  %228 = vmatpush3.bf16.msra.mxu0 %v105_v8 }
  0x1d   :  { %234 = vmatmul.mubr.msk.bf16.vlgmr.msra.gmra.mrb[0].mxu1 %vm93_vm2, %v267_v9  ;;  %230 = vmatmul.mubr.msk.bf16.vlgmr.msra.gmra.mrb[0].mxu0 %vm93_vm2, %v268_v10 }
  0x1e   :  { %237 = vmatprep.mubr.msk.bf16.mxu1 %vm295_vm0, %v294_v1 }
  0x25   :  { %238 = vmatmul.mubr.msk.bf16.gmra.mrb[4].mxu1 %vm93_vm2, %v269_v11 }
  0xf0   :  { %v149_v13 = vpop.f32.mrb[0].mxu1  ;;  %v141_v14 = vpop.f32.mrb[0].mxu0 }
  0xf1   :  { %v150_v15 = vadd.f32 %v191_v12, %v149_v13  ;;  %v235_v16 = vpop.f32.mrb[1].mxu1  ;;  %v142_v17 = vadd.f32 %v191_v12, %v141_v14  ;;  %v231_v18 = vpop.f32.mrb[1].mxu0 }
  0xf2   :  { %v152_v19 = vpop.f32.mrb[2].mxu1  ;;  %v144_v20 = vpop.f32.mrb[2].mxu0 }
  0xf3   :  { %v165_v21 = vmax.f32 %v150_v15, 0.0  ;;  %v153_v22 = vadd.f32 %v191_v12, %v152_v19  ;;  %v163_v23 = vmax.f32 %v142_v17, 0.0  ;;  %v236_v24 = vpop.f32.mrb[3].mxu1  ;;  %v145_v25 = vadd.f32 %v191_v12, %v144_v20  ;;  %v232_v26 = vpop.f32.mrb[3].mxu0 }
  0xf5   :  { %171 = vst.msk [vmem:[#allocation2 + $0x10] sm:$0xff] %vm168_vm3, %v165_v21  ;;  %v166_v27 = vmax.f32 %v153_v22, 0.0  ;;  %169 = vst.msk [vmem:[#allocation2] sm:$0xff] %vm168_vm3, %v163_v23  ;;  %v164_v28 = vmax.f32 %v145_v25, 0.0 }
  0xf7   :  { %172 = vst.msk [vmem:[#allocation2 + $0x18] sm:$0xff] %vm168_vm3, %v166_v27  ;;  %170 = vst.msk [vmem:[#allocation2 + $0x8] sm:$0xff] %vm168_vm3, %v164_v28 }
  0xf8   :  { %v157_v29 = vpop.f32.mrb[4].mxu1 }
  0xf9   :  { %v158_v30 = vadd.f32 %v191_v12, %v157_v29  ;;  %v239_v31 = vpop.f32.mrb[5].mxu1 }
  0xfa   :  { %v160_v32 = vpop.f32.mrb[6].mxu1 }
  0xfb   :  { %v167_v33 = vmax.f32 %v158_v30, 0.0  ;;  %v240_v34 = vpop.f32.mrb[7].mxu1 }
  0xfd   :  { %174 = vst.msk [vmem:[#allocation2 + $0x20] sm:$0x1f] %vm173_vm4, %v167_v33 }
  0xfe   :  { %281 = shalt.err (!%p278_p4)
}
  0xff   :  { %s282_s9 = scalar_lea.hbm %s370_s3, 640 }
 0x100   :  { %p283_p5 = scmp.ne.s32.totalorder %s370_s3, %s282_s9  ;;  %p286_p6 = scmp.lt.u32.totalorder %s282_s9, %s370_s3 }
 0x102   :  { %p288_p7 = pnand %p286_p6, %p283_p5 }
 0x104   :  { %291 = shalt.err (!%p288_p7)
}
 0x105   :  { %s297_s14 = smov 128   ;;  %s298_s15 = smov 8  }
 0x106   :  { %186 = dma.vmem_to_hbm [thread:$0]  %s181_s2, 640, %s370_s3, [#allocation3], %s297_s14, %s297_s14, %s298_s15  }
 0x107   :  { %292 = dma.done.wait [#allocation3], 640  }
 0x108   :  { %293 = vsyncadd [#allocation3], 4294966656 }
 0x109   :  { %190 = vsyncpa [#allocation3], 1 }

</bundles_post_ra>
